<compile_context>
chip_gen: v6e
topology: v6e:2x2x1
jax: 0.10.0
libtpu: 0.0.40
codegen_flags: <defaults>
</compile_context>

<pallas_src>
import functools
from dataclasses import dataclass

import jax
import jax.numpy as jnp
from jax.experimental import pallas as pl
from jax.experimental.pallas import tpu as pltpu


@dataclass(frozen=True)
class HParams:
    use_gate: bool = True
    gate_mode: str = "double"        # 'double' implemented in-kernel
    select_loss: str = "both"        # 'hard' | 'soft' | 'both'
    select_mode: str = "none"
    filter_mode: str = "threshold"   # 'threshold' | 'topk' (selection in JAX glue)
    max_triple_num: int = 8
    select_k: int = 4
    select_threshold: float = 0.5


def _gate_kernel(story_ref, inf_ref, wu_ref, ub_ref, lab_ref,
                 score_ref, loss_ref, *, select_loss):
    story = story_ref[...]                 # [BT, E] f32 (story broadcast over T)
    inf = inf_ref[...]                     # [BT, E] f32
    w = wu_ref[0:1, :]                     # [1, E]  Linear W (no bias)
    u = wu_ref[1:2, :]                     # [1, E]  Linear U weight
    ub = ub_ref[0]                         # scalar  Linear U bias (SMEM)

    # sentence_logits = W(story) + U(inference), fused into one mul-add plus a
    # single lane (XLU) reduction.  Stays on VPU/XLU by design (E=32, N=1).
    combined = story * w + inf * u                                   # [BT, E]
    logits = jnp.sum(combined, axis=-1, keepdims=True) + ub          # [BT, 1]
    score = jax.nn.sigmoid(logits)                                   # [BT, 1]
    score_ref[...] = score

    # PyTorch BCELoss semantics: mean reduction, log clamped at -100.
    logp = jnp.maximum(jnp.log(score), -100.0)
    log1mp = jnp.maximum(jnp.log(1.0 - score), -100.0)
    inv_n = 1.0 / float(score.shape[0] * score.shape[1])
    labels = lab_ref[...]                  # [BT, 2]  col0 = soft, col1 = hard

    if select_loss == "both":
        # bce(score, soft) + bce(score, hard), fused into ONE reduction pass:
        #   = -(1/N) * sum[(soft+hard)*logp + (2-soft-hard)*log1mp]
        y = jnp.sum(labels, axis=1, keepdims=True)                   # soft + hard
        loss = -jnp.sum(y * logp + (2.0 - y) * log1mp) * inv_n
    elif select_loss == "soft":
        y = labels[:, 0:1]
        loss = -jnp.sum(y * logp + (1.0 - y) * log1mp) * inv_n
    elif select_loss == "hard":
        y = labels[:, 1:2]
        loss = -jnp.sum(y * logp + (1.0 - y) * log1mp) * inv_n
    else:
        raise ValueError("parameter select_loss error")

    loss_ref[0] = loss                     # scalar loss straight to SMEM


def init_gate_params(key, n_embd):
    """Deterministic synthetic parameters: W: Linear(E,1,no bias); U: Linear(E,1)."""
    kw, ku, kb = jax.random.split(key, 3)
    bound = 1.0 / jnp.sqrt(n_embd)
    return {
        "W": jax.random.uniform(kw, (1, n_embd), jnp.float32, -bound, bound),
        "U": jax.random.uniform(ku, (1, n_embd), jnp.float32, -bound, bound),
        "U_b": jax.random.uniform(kb, (1,), jnp.float32, -bound, bound),
    }


@functools.lru_cache(maxsize=None)
def _build_forward(hparams):
    """Build a single jitted forward for a static hparams config."""
    if hparams.gate_mode != "double":
        # TODO(synk): gate_mode='single' (nn.Bilinear) path not implemented in this kernel.
        raise NotImplementedError("only gate_mode='double' is implemented")
    if hparams.select_loss not in ("hard", "soft", "both"):
        raise ValueError("parameter select_loss error")
    if hparams.filter_mode not in ("threshold", "topk"):
        raise ValueError("parameter select_mode error")

    kernel = functools.partial(_gate_kernel, select_loss=hparams.select_loss)
    vmem = pl.BlockSpec(memory_space=pltpu.MemorySpace.VMEM)
    smem = pl.BlockSpec(memory_space=pltpu.MemorySpace.SMEM)

    @jax.jit
    def fwd(params, story_hidden_state, inference_hidden_state,
            score_soft_label, score_hard_label):
        B, T, E = inference_hidden_state.shape
        BT = B * T

        # Lane-friendly 2-D layouts for the kernel (E on lanes, rows on sublanes).
        story_f = jnp.broadcast_to(
            story_hidden_state[:, None, :], (B, T, E)
        ).reshape(BT, E).astype(jnp.float32)
        inf_f = inference_hidden_state.reshape(BT, E).astype(jnp.float32)
        wu = jnp.concatenate(
            [params["W"], params["U"]], axis=0).astype(jnp.float32)      # [2, E]
        ub = params["U_b"].astype(jnp.float32).reshape(1)                # [1] SMEM
        labels = jnp.stack(
            [score_soft_label.reshape(BT).astype(jnp.float32),
             score_hard_label.reshape(BT).astype(jnp.float32)],
            axis=1)                                                      # [BT, 2]

        score_flat, loss = pl.pallas_call(
            kernel,
            out_shape=(
                jax.ShapeDtypeStruct((BT, 1), jnp.float32),   # sentence_score (flat)
                jax.ShapeDtypeStruct((1,), jnp.float32),      # select_loss (SMEM scalar)
            ),
            in_specs=[vmem, vmem, vmem, smem, vmem],
            out_specs=(vmem, smem),
        )(story_f, inf_f, wu, ub, labels)

        sentence_score = score_flat.reshape(B, T)
        select_loss_val = loss[0]

        # Selection (filter_mode) in plain JAX glue, fused by jit.
        if hparams.filter_mode == "topk":
            # torch.kthvalue(k): k-th smallest along dim=1 (1-indexed).
            k = hparams.max_triple_num - hparams.select_k
            thresh = jnp.sort(sentence_score, axis=1)[:, k - 1:k]
            select_index = (sentence_score > thresh).astype(jnp.int32)
        else:  # 'threshold'
            select_index = (
                sentence_score > hparams.select_threshold).astype(jnp.int32)

        # TODO(synk): `classfication_evaluate` is an undefined external helper in
        # the source module; standard per-batch precision/recall/F1/accuracy
        # averaged over the batch is computed here instead.
        hard_i = score_hard_label.astype(jnp.int32)
        tp = jnp.sum((select_index == 1) & (hard_i == 1), axis=1).astype(jnp.float32)
        fp = jnp.sum((select_index == 1) & (hard_i == 0), axis=1).astype(jnp.float32)
        fn = jnp.sum((select_index == 0) & (hard_i == 1), axis=1).astype(jnp.float32)
        tn = jnp.sum((select_index == 0) & (hard_i == 0), axis=1).astype(jnp.float32)
        eps = 1e-8
        precision = tp / (tp + fp + eps)
        recall = tp / (tp + fn + eps)
        f1 = 2.0 * precision * recall / (precision + recall + eps)
        accuracy = (tp + tn) / (tp + tn + fp + fn + eps)
        metrics = jnp.stack([jnp.mean(precision), jnp.mean(recall),
                             jnp.mean(f1), jnp.mean(accuracy)])

        return sentence_score, select_index, select_loss_val, metrics

    return fwd


def gate_model_forward(hparams, params, story_hidden_state,
                       inference_hidden_state, score_soft_label,
                       score_hard_label):
    B, T, E = inference_hidden_state.shape
    assert story_hidden_state.shape == (B, E)
    assert T == hparams.max_triple_num

    fwd = _build_forward(hparams)
    score, idx, loss, metrics = fwd(params, story_hidden_state,
                                    inference_hidden_state,
                                    score_soft_label, score_hard_label)

    # Single device->host pull for all four metrics (avoids 4 blocking syncs).
    m = jax.device_get(metrics)
    ret_classification = {
        "precision": float(m[0]),
        "recall": float(m[1]),
        "f1": float(m[2]),
        "accuracy": float(m[3]),
    }
    return score, idx, loss, ret_classification


if __name__ == "__main__":
    hparams = HParams()
    B, T, E = 2, hparams.max_triple_num, 32   # batch=2, max_triple_num=8, n_embd=32

    key = jax.random.PRNGKey(0)
    k_par, k_story, k_inf, k_soft, k_hard = jax.random.split(key, 5)

    params = init_gate_params(k_par, E)
    story_hidden_state = jax.random.normal(k_story, (B, E), jnp.float32)
    inference_hidden_state = jax.random.normal(k_inf, (B, T, E), jnp.float32)
    score_soft_label = jax.random.uniform(k_soft, (B, T), jnp.float32)
    score_hard_label = jax.random.bernoulli(k_hard, 0.5, (B, T)).astype(jnp.int32)

    score, idx, loss, ret = gate_model_forward(
        hparams, params, story_hidden_state, inference_hidden_state,
        score_soft_label, score_hard_label)

    jax.block_until_ready((score, idx, loss))
    assert score.shape == (B, T) and idx.shape == (B, T) and loss.shape == ()
    assert idx.dtype == jnp.int32
    assert all(k in ret for k in ("precision", "recall", "f1", "accuracy"))
    print("KERNEL_OK")
</pallas_src>

<mosaic_0001>
module attributes {stable_mosaic.version = 11 : i64} {
  func.func @_gate_kernel(%arg0: memref<16x32xf32, #tpu.memory_space<vmem>>, %arg1: memref<16x32xf32, #tpu.memory_space<vmem>>, %arg2: memref<2x32xf32, #tpu.memory_space<vmem>>, %arg3: memref<1xf32, #tpu.memory_space<smem>>, %arg4: memref<16x2xf32, #tpu.memory_space<vmem>>, %arg5: memref<16x1xf32, #tpu.memory_space<vmem>>, %arg6: memref<1xf32, #tpu.memory_space<smem>>) attributes {dimension_semantics = [], scalar_prefetch = 0 : i64, scratch_operands = 0 : i64, tpu.core_type = #tpu.core_type<tc>} {
    %c0 = arith.constant 0 : index
    %c0_0 = arith.constant 0 : index
    %0 = vector.load %arg0[%c0, %c0_0] : memref<16x32xf32, #tpu.memory_space<vmem>>, vector<16x32xf32>
    %c0_1 = arith.constant 0 : index
    %c0_2 = arith.constant 0 : index
    %1 = vector.load %arg1[%c0_1, %c0_2] : memref<16x32xf32, #tpu.memory_space<vmem>>, vector<16x32xf32>
    %c0_3 = arith.constant 0 : index
    %c0_4 = arith.constant 0 : index
    %2 = vector.load %arg2[%c0_3, %c0_4] : memref<2x32xf32, #tpu.memory_space<vmem>>, vector<1x32xf32>
    %c1 = arith.constant 1 : index
    %c0_5 = arith.constant 0 : index
    %3 = vector.load %arg2[%c1, %c0_5] : memref<2x32xf32, #tpu.memory_space<vmem>>, vector<1x32xf32>
    %c0_6 = arith.constant 0 : index
    %4 = memref.load %arg3[%c0_6] : memref<1xf32, #tpu.memory_space<smem>>
    %5 = vector.broadcast %2 : vector<1x32xf32> to vector<16x32xf32>
    %6 = arith.mulf %0, %5 : vector<16x32xf32>
    %7 = vector.broadcast %3 : vector<1x32xf32> to vector<16x32xf32>
    %8 = arith.mulf %1, %7 : vector<16x32xf32>
    %9 = arith.addf %6, %8 : vector<16x32xf32>
    %cst = arith.constant dense<0.000000e+00> : vector<16xf32>
    %10 = vector.multi_reduction <add>, %9, %cst [1] : vector<16x32xf32> to vector<16xf32>
    %11 = vector.shape_cast %10 : vector<16xf32> to vector<16x1xf32>
    %12 = vector.broadcast %4 : f32 to vector<16x1xf32>
    %13 = arith.addf %11, %12 : vector<16x1xf32>
    %14 = arith.negf %13 : vector<16x1xf32>
    %15 = math.exp %14 : vector<16x1xf32>
    %cst_7 = arith.constant 1.000000e+00 : f32
    %16 = vector.broadcast %cst_7 : f32 to vector<16x1xf32>
    %17 = arith.addf %16, %15 : vector<16x1xf32>
    %18 = arith.divf %16, %17 : vector<16x1xf32>
    %c0_8 = arith.constant 0 : index
    %c0_9 = arith.constant 0 : index
    %19 = vector.load %arg5[%c0_8, %c0_9] : memref<16x1xf32, #tpu.memory_space<vmem>>, vector<16x1xf32>
    tpu.vector_store %arg5[%c0_8, %c0_9], %18 {strides = array<i32>} : memref<16x1xf32, #tpu.memory_space<vmem>>, vector<16x1xf32>,
    %20 = math.log %18 : vector<16x1xf32>
    %cst_10 = arith.constant -1.000000e+02 : f32
    %21 = vector.broadcast %cst_10 : f32 to vector<16x1xf32>
    %22 = arith.maximumf %20, %21 : vector<16x1xf32>
    %cst_11 = arith.constant 1.000000e+00 : f32
    %23 = vector.broadcast %cst_11 : f32 to vector<16x1xf32>
    %24 = arith.subf %23, %18 : vector<16x1xf32>
    %25 = math.log %24 : vector<16x1xf32>
    %cst_12 = arith.constant -1.000000e+02 : f32
    %26 = vector.broadcast %cst_12 : f32 to vector<16x1xf32>
    %27 = arith.maximumf %25, %26 : vector<16x1xf32>
    %c0_13 = arith.constant 0 : index
    %c0_14 = arith.constant 0 : index
    %28 = vector.load %arg4[%c0_13, %c0_14] : memref<16x2xf32, #tpu.memory_space<vmem>>, vector<16x2xf32>
    %cst_15 = arith.constant dense<0.000000e+00> : vector<16xf32>
    %29 = vector.multi_reduction <add>, %28, %cst_15 [1] : vector<16x2xf32> to vector<16xf32>
    %30 = vector.shape_cast %29 : vector<16xf32> to vector<16x1xf32>
    %31 = arith.mulf %30, %22 : vector<16x1xf32>
    %cst_16 = arith.constant 2.000000e+00 : f32
    %32 = vector.broadcast %cst_16 : f32 to vector<16x1xf32>
    %33 = arith.subf %32, %30 : vector<16x1xf32>
    %34 = arith.mulf %33, %27 : vector<16x1xf32>
    %35 = arith.addf %31, %34 : vector<16x1xf32>
    %36 = vector.shape_cast %35 : vector<16x1xf32> to vector<1x16x1xf32>
    %cst_17 = arith.constant dense<0.000000e+00> : vector<1xf32>
    %37 = vector.multi_reduction <add>, %36, %cst_17 [1, 2] : vector<1x16x1xf32> to vector<1xf32>
    %38 = vector.shape_cast %37 : vector<1xf32> to vector<1x1x1xf32>
    %39 = vector.extract %38[0, 0, 0] : f32 from vector<1x1x1xf32>
    %cst_18 = arith.constant 0.000000e+00 : f32
    %40 = arith.subf %cst_18, %39 : f32
    %cst_19 = arith.constant 6.250000e-02 : f32
    %41 = arith.mulf %40, %cst_19 : f32
    %c0_20 = arith.constant 0 : index
    %42 = memref.load %arg6[%c0_20] : memref<1xf32, #tpu.memory_space<smem>>
    memref.store %41, %arg6[%c0_20] : memref<1xf32, #tpu.memory_space<smem>>
    return
  }
}

</mosaic_0001>

<bundles_post_ra>
// kernel: fwd.1
= control target key start
LH: loop header
LB: loop body
LE: loop exit
PB: predicated region body
PF: predicated region fallthrough
CT: control target
= control target key end

     0   :  { %vm86_vm0 = vcmask 15360   ;;  %s245_s0 = inlined_call_operand.vmem [shape: f32[16,32], index: 0, kind: input, shape index: {}]   ;;  %s246_s1 = inlined_call_operand.vmem [shape: f32[16,32], index: 1, kind: input, shape index: {}]   ;;  %s247_s2 = inlined_call_operand.vmem [shape: f32[2,32], index: 2, kind: input, shape index: {}]   ;;  %s248_s3 = inlined_call_operand.<no memory space> [shape: f32[1], index: 3, kind: input, shape index: {}]   ;;  %s249_s4 = inlined_call_operand.vmem [shape: f32[16,2], index: 4, kind: input, shape index: {}]   ;;  %s250_s5 = inlined_call_operand.vmem [shape: f32[16,1], index: 5, kind: output, shape index: {0}]   ;;  %s251_s6 = inlined_call_operand.hbm [shape: f32[1], index: 6, kind: output, shape index: {1}]  }
   0x1   :  { %v24_v0 = vld [vmem:[%s245_s0] sm:$0xff]  ;;  %v25_v5 = vld [vmem:[%s245_s0 + $0x8] sm:$0xff] }
   0x2   :  { %v26_v1 = vld [vmem:[%s246_s1] sm:$0xff]  ;;  %v27_v6 = vld [vmem:[%s246_s1 + $0x8] sm:$0xff] }
   0x3   :  { %v134_v2 = vld [vmem:[%s247_s2] ss:$0 sm:$0xff]  ;;  %v135_v3 = vld [vmem:[%s247_s2 + $0x1] ss:$0 sm:$0xff]  ;;  %v85_v11 = vld [vmem:[%s249_s4 + $0x8] sm:$0xff] }
   0x4   :  { %v35_v4 = vmul.f32 %v134_v2, %v24_v0  ;;  %v41_v7 = vmul.f32 %v135_v3, %v26_v1  ;;  %v36_v8 = vmul.f32 %v134_v2, %v25_v5  ;;  %v42_v9 = vmul.f32 %v135_v3, %v27_v6  ;;  %v84_v10 = vld [vmem:[%s249_s4] sm:$0xff] }
   0x5   :  { %13 = vsyncpa [#allocation4], 0  ;;  %vm45_vm1 = vcmask 261120   ;;  %v87_v12 = vsel %vm86_vm0, %v84_v10, 0.0  ;;  %v90_v15 = vsel %vm86_vm0, %v85_v11, 0.0  ;;  %v52_v18 = vstv %s248_s3  ;;  %s167_s16 = smov [#allocation3]  }
   0x6   :  { %v43_v13 = vadd.f32 %v41_v7, %v35_v4  ;;  %v44_v14 = vadd.f32 %v42_v9, %v36_v8  ;;  %88 = vadd.xlane.f32.xlu1 %v87_v12  ;;  %vm67_vm2 = vcmask 7168  }
   0x8   :  { %v46_v16 = vsel %vm45_vm1, %v43_v13, 0.0  ;;  %v49_v17 = vsel %vm45_vm1, %v44_v14, 0.0 }
   0x9   :  { %47 = vadd.xlane.f32.xlu0 %v46_v16 }
   0xa   :  { %91 = vadd.xlane.f32.xlu1 %v90_v15 }
   0xd   :  { %50 = vadd.xlane.f32.xlu0 %v49_v17 }
  0x8f   :  { %v89_v33 = vpop.xlane.xlu1 %88 }
  0x90   :  { %v95_v38 = vsub.f32 2.0, %v89_v33 }
  0x92   :  { %v48_v19 = vpop.xlane.xlu0 %47 }
  0x93   :  { %v53_v20 = vadd.f32 %v52_v18, %v48_v19  ;;  %v92_v40 = vpop.xlane.xlu1 %91 }
  0x94   :  { %v96_v48 = vsub.f32 2.0, %v92_v40 }
  0x95   :  { %v136_v21 = vmul.f32 -1.442695, %v53_v20 }
  0x96   :  { %v51_v22 = vpop.xlane.xlu0 %50 }
  0x97   :  { %141 = vpow2.f32 %v136_v21  ;;  %v54_v23 = vadd.f32 %v52_v18, %v51_v22 }
  0x99   :  { %v137_v24 = vmul.f32 -1.442695, %v54_v23 }
  0x9b   :  { %143 = vpow2.f32 %v137_v24 }
  0xa4   :  { %v142_v25 = vpop.eup %141 }
  0xa5   :  { %v61_v26 = vadd.f32 1.0, %v142_v25 }
  0xa7   :  { %145 = vrcp.f32 %v61_v26 }
  0xa8   :  { %v144_v27 = vpop.eup %143 }
  0xa9   :  { %v62_v28 = vadd.f32 1.0, %v144_v27 }
  0xab   :  { %147 = vrcp.f32 %v62_v28 }
  0xb4   :  { %v146_v29 = vpop.eup %145 }
  0xb5   :  { %149 = vlog2.f32 %v146_v29  ;;  %v76_v30 = vsub.f32 1.0, %v146_v29  ;;  %68 = vst.msk [vmem:[%s250_s5] sm:$0xff] %vm67_vm2, %v146_v29 }
  0xb7   :  { %151 = vlog2.f32 %v76_v30 }
  0xb8   :  { %v148_v31 = vpop.eup %147 }
  0xb9   :  { %153 = vlog2.f32 %v148_v31  ;;  %v77_v32 = vsub.f32 1.0, %v148_v31  ;;  %69 = vst.msk [vmem:[%s250_s5 + $0x8] sm:$0xff] %vm67_vm2, %v148_v31 }
  0xbb   :  { %155 = vlog2.f32 %v77_v32 }
  0xc2   :  { %v150_v34 = vpop.eup %149 }
  0xc3   :  { %v71_v35 = vmul.f32 0.6931472, %v150_v34 }
  0xc4   :  { %v152_v36 = vpop.eup %151 }
  0xc5   :  { %v79_v37 = vmul.f32 0.6931472, %v152_v36  ;;  %v74_v41 = vmax.f32 %v71_v35, -100.0 }
  0xc6   :  { %v154_v39 = vpop.eup %153 }
  0xc7   :  { %v82_v42 = vmax.f32 %v79_v37, -100.0  ;;  %v73_v43 = vmul.f32 0.6931472, %v154_v39  ;;  %v93_v49 = vmul.f32 %v89_v33, %v74_v41 }
  0xc8   :  { %v156_v44 = vpop.eup %155 }
  0xc9   :  { %v97_v45 = vmul.f32 %v95_v38, %v82_v42  ;;  %v75_v46 = vmax.f32 %v73_v43, -100.0  ;;  %v81_v47 = vmul.f32 0.6931472, %v156_v44 }
  0xcb   :  { %v83_v50 = vmax.f32 %v81_v47, -100.0  ;;  %v99_v51 = vadd.f32 %v97_v45, %v93_v49  ;;  %v94_v52 = vmul.f32 %v92_v40, %v75_v46 }
  0xcd   :  { %v98_v53 = vmul.f32 %v96_v48, %v83_v50  ;;  %v101_v55 = vsel %vm67_vm2, %v99_v51, 0.0 }
  0xcf   :  { %v100_v54 = vadd.f32 %v98_v53, %v94_v52 }
  0xd1   :  { %v102_v56 = vsel %vm67_vm2, %v100_v54, 0.0 }
  0xd2   :  { %v103_v57 = vadd.f32 %v102_v56, %v101_v55 }
  0xd4   :  { %104 = vadd.xlane.f32.xlu0 %v103_v57 }
 0x15d   :  { %v105_v58 = vpop.xlane.xlu0 %104 }
 0x15e   :  { %v106_v59 = vrot.slane %v105_v58, 4 }
 0x160   :  { %v107_v60 = vadd.f32 %v106_v59, %v105_v58 }
 0x162   :  { %v108_v61 = vrot.slane %v107_v60, 2 }
 0x164   :  { %v109_v62 = vadd.f32 %v108_v61, %v107_v60 }
 0x166   :  { %v110_v63 = vrot.slane %v109_v62, 1 }
 0x168   :  { %v111_v0 = vadd.f32 %v110_v63, %v109_v62 }
 0x16a   :  { %138 = vpush %v111_v0 }
 0x19b   :  { %s139_s5 = spop %138 }
 0x19c   :  { %s113_s14 = ssub.f32 0.0, %s139_s5 }
 0x19e   :  { %s114_s15 = smul.f32 0.0625, %s113_s14 }
 0x1a0   :  { %116 = sst [smem:[#allocation3]] %s114_s15 }
 0x1a1   :  { %126 = dma.smem_to_hbm %s167_s16, 16, %s251_s6, [#allocation4]  }
 0x1a2   :  { %165 = dma.done.wait [#allocation4], 16  }
 0x1a3   :  { %166 = vsyncadd [#allocation4], 4294967280 }
 0x1a4   :  { %132 = sfence }
 0x1a5   :  { %133 = vsyncpa [#allocation4], 1 }

</bundles_post_ra>
